<compile_context>
chip_gen: v5e
topology: v5e:2x2
jax: 0.10.0
libtpu: 0.0.40
codegen_flags: <defaults>
</compile_context>

<pallas_src>
import numpy as np

import jax
import jax.numpy as jnp
from jax.experimental import pallas as pl
from jax.experimental.pallas import tpu as pltpu


def _round_up(n, m):
    return ((n + m - 1) // m) * m


def _mlp_kernel(x_ref, w1_ref, b1_ref, w2_ref, b2_ref, out_ref, relu_ref, acc_ref):
    """One (batch_tile, hidden_tile) grid step.

    fc1 for this hidden tile -> bias + ReLU (f32, VPU) -> store bf16 residual ->
    accumulate this tile's fc2 contribution into the f32 scratch; on the last
    hidden tile add b2 and store the output block.
    """
    h_idx = pl.program_id(1)

    @pl.when(h_idx == 0)
    def _():
        acc_ref[...] = jnp.zeros_like(acc_ref)

    # fc1: bf16 operands on the MXU, f32 accumulation.
    h = jnp.dot(x_ref[...], w1_ref[...], preferred_element_type=jnp.float32)
    h = h + b1_ref[...]                    # (1, th) broadcasts over the batch tile
    r = jnp.maximum(h, 0.0)
    rb = r.astype(relu_ref.dtype)          # single bf16 cast, reused for fc2
    relu_ref[...] = rb

    # fc2 partial product for this hidden tile (f32 accumulation in scratch).
    acc_ref[...] += jnp.dot(rb, w2_ref[...], preferred_element_type=jnp.float32)

    @pl.when(h_idx == pl.num_programs(1) - 1)
    def _():
        out_ref[...] = (acc_ref[...] + b2_ref[...]).astype(out_ref.dtype)


def make_mlp_forward(w1_t, b1, w2_t, b2, *, compute_dtype=jnp.bfloat16,
                     weight_budget_bytes=40 << 20, tm=None):
    """Pad/cast parameters once; return a jitted forward(x) -> (output, relu).

    w1_t: [D_in, H]  (weight pre-transposed to [in, out]),  b1: [H]
    w2_t: [H, O],                                           b2: [O]

    `output` is returned in x.dtype; the `relu` residual is returned in
    `compute_dtype` (bf16) -- exactly the value the second matmul consumed.
    """
    D_in, H = w1_t.shape
    H2, O = w2_t.shape
    assert H2 == H and b1.shape == (H,) and b2.shape == (O,)

    csz = np.dtype(compute_dtype).itemsize
    d_pad = _round_up(D_in, 128)
    o_pad = _round_up(O, 128)

    # Hidden tile: keep the full hidden dim resident when W1+W2 fit the budget,
    # otherwise K-tile the hidden axis (the fc2 reduction axis).
    h_pad_min = _round_up(H, 128)
    if (d_pad + o_pad) * h_pad_min * csz <= weight_budget_bytes:
        th = h_pad_min
    else:
        per_tile = 2 * (d_pad + o_pad) * csz        # double-buffered when tiled
        th = max(128, (weight_budget_bytes // per_tile) // 128 * 128)
    h_pad = _round_up(H, th)
    nh = h_pad // th
    resident = nh == 1          # weight blocks never change across the grid

    # --- pad / cast parameters ONCE (outside the per-call hot path) ----------
    # Zero padding is semantically neutral: padded K rows/cols contribute 0 to
    # the dots and padded bias lanes are 0.
    w1p = jnp.zeros((d_pad, h_pad), compute_dtype).at[:D_in, :H].set(
        w1_t.astype(compute_dtype))
    w2p = jnp.zeros((h_pad, o_pad), compute_dtype).at[:H, :O].set(
        w2_t.astype(compute_dtype))
    b1p = jnp.zeros((1, h_pad), jnp.float32).at[0, :H].set(b1.astype(jnp.float32))
    b2p = jnp.zeros((1, o_pad), jnp.float32).at[0, :O].set(b2.astype(jnp.float32))

    def _weight_spec(shape, index_map):
        if resident:
            # Constant block index -> single-buffer (halves its VMEM footprint).
            return pl.BlockSpec(shape, index_map, pipeline_mode=pl.Buffered(1))
        return pl.BlockSpec(shape, index_map)

    @jax.jit
    def forward(x):
        B, D = x.shape
        assert D == D_in, "input feature size mismatch"
        out_dtype = x.dtype
        out_isz = x.dtype.itemsize

        try:
            vmem_cap = pltpu.get_tpu_info().vmem_capacity_bytes
        except Exception:
            vmem_cap = 64 << 20                   # conservative (v7x per-TC)

        if tm is not None:
            tm_ = max(8, _round_up(tm, 8))
        else:
            # >= 2 batch tiles so ("parallel", ...) can shard across v7x's two
            # TensorCores; bigger 512-row tiles on 128-MiB-VMEM parts when the
            # weights are fully resident.
            tm_cap = 512 if (resident and vmem_cap >= (96 << 20)) else 256
            tm_ = max(8, min(tm_cap, _round_up(-(-B // 2), 8)))
        b_pad = _round_up(B, tm_)
        nb = b_pad // tm_

        xc = x.astype(compute_dtype)
        if (b_pad, d_pad) == (B, D_in):
            xp = xc                               # already aligned: no pad copy
        else:
            xp = jnp.zeros((b_pad, d_pad), compute_dtype).at[:B, :D_in].set(xc)

        # VMEM budget: x/out/relu tiles double-buffered; weights single- or
        # double-buffered depending on residency; + f32 accumulator scratch.
        nbuf_w = 1 if resident else 2
        vmem_needed = (
            2 * tm_ * d_pad * csz
            + nbuf_w * (d_pad * th + th * o_pad) * csz
            + nbuf_w * th * 4 + o_pad * 4
            + 2 * tm_ * o_pad * out_isz
            + 2 * tm_ * th * csz
            + tm_ * o_pad * 4
        )
        vmem_limit = int(min(max(int(vmem_needed * 1.3) + (2 << 20), 32 << 20),
                             vmem_cap))

        cost = pl.CostEstimate(
            flops=2 * b_pad * h_pad * (d_pad + o_pad),
            transcendentals=0,
            bytes_accessed=(b_pad * d_pad * csz
                            + (d_pad * h_pad + h_pad * o_pad) * csz
                            + (h_pad + o_pad) * 4
                            + b_pad * o_pad * out_isz
                            + b_pad * h_pad * csz),
        )

        out_p, relu_p = pl.pallas_call(
            _mlp_kernel,
            out_shape=(
                jax.ShapeDtypeStruct((b_pad, o_pad), out_dtype),      # output
                jax.ShapeDtypeStruct((b_pad, h_pad), compute_dtype),  # relu residual (bf16)
            ),
            grid=(nb, nh),                                            # reduction axis last
            in_specs=[
                pl.BlockSpec((tm_, d_pad), lambda i, h: (i, 0)),      # x: batch-tiled
                _weight_spec((d_pad, th), lambda i, h: (0, h)),       # W1 column tile
                _weight_spec((1, th), lambda i, h: (0, h)),           # b1 tile
                _weight_spec((th, o_pad), lambda i, h: (h, 0)),       # W2 row tile
                pl.BlockSpec((1, o_pad), lambda i, h: (0, 0),
                             pipeline_mode=pl.Buffered(1)),           # b2: constant
            ],
            out_specs=(
                pl.BlockSpec((tm_, o_pad), lambda i, h: (i, 0)),      # resident over h
                pl.BlockSpec((tm_, th), lambda i, h: (i, h)),
            ),
            scratch_shapes=[pltpu.VMEM((tm_, o_pad), jnp.float32)],   # fc2 accumulator
            compiler_params=pltpu.CompilerParams(
                dimension_semantics=("parallel", "arbitrary"),
                vmem_limit_bytes=vmem_limit,
            ),
            cost_estimate=cost,
        )(xp, w1p, b1p, w2p, b2p)

        # TODO(synk): optionally skip the relu residual output (flag) for
        # callers that recompute ReLU in backward; it dominates HBM writeback
        # when O is small.
        return out_p[:B, :O], relu_p[:B, :H]

    return forward


def init_linear_params(key, in_features, out_features, dtype=jnp.float32):
    """Deterministic init mimicking torch.nn.Linear (uniform +-1/sqrt(fan_in)).
    Returns weight already transposed to [in, out]."""
    k_w, k_b = jax.random.split(key)
    bound = 1.0 / jnp.sqrt(jnp.asarray(in_features, dtype=jnp.float32))
    w_t = jax.random.uniform(
        k_w, (in_features, out_features), dtype=dtype, minval=-bound, maxval=bound
    )
    b = jax.random.uniform(
        k_b, (out_features,), dtype=dtype, minval=-bound, maxval=bound
    )
    return w_t, b


if __name__ == "__main__":
    # Small shapes consistent with the module: MLP(input_size=32, hidden=64, output=16)
    batch = 8
    input_size = 32
    hidden_size = 64
    output_size = 16

    key = jax.random.PRNGKey(0)
    k_x, k_fc1, k_fc2 = jax.random.split(key, 3)

    x = jax.random.normal(k_x, (batch, input_size), dtype=jnp.float32)
    w1_t, b1 = init_linear_params(k_fc1, input_size, hidden_size)
    w2_t, b2 = init_linear_params(k_fc2, hidden_size, output_size)

    mlp = make_mlp_forward(w1_t, b1, w2_t, b2)
    output, relu = mlp(x)
    jax.block_until_ready((output, relu))

    # Reference with the same bf16-operand / f32-accumulate numerics.
    xb = x.astype(jnp.bfloat16)
    w1b = w1_t.astype(jnp.bfloat16)
    w2b = w2_t.astype(jnp.bfloat16)
    h_ref = jnp.maximum(
        jnp.dot(xb, w1b, preferred_element_type=jnp.float32) + b1, 0.0)
    o_ref = jnp.dot(h_ref.astype(jnp.bfloat16), w2b,
                    preferred_element_type=jnp.float32) + b2

    assert output.shape == (batch, output_size)
    assert relu.shape == (batch, hidden_size)
    assert output.dtype == x.dtype
    assert jnp.allclose(relu.astype(jnp.float32), h_ref, atol=2e-2, rtol=2e-2), \
        "relu mismatch"
    assert jnp.allclose(output, o_ref, atol=2e-2, rtol=2e-2), "output mismatch"

    print("KERNEL_OK")
</pallas_src>

<mosaic_0001>
module attributes {stable_mosaic.version = 11 : i64} {
  func.func @_mlp_kernel(%arg0: i32, %arg1: i32, %arg2: memref<8x128xbf16, #tpu.memory_space<vmem>>, %arg3: memref<128x128xbf16, #tpu.memory_space<vmem>>, %arg4: memref<1x128xf32, #tpu.memory_space<vmem>>, %arg5: memref<128x128xbf16, #tpu.memory_space<vmem>>, %arg6: memref<1x128xf32, #tpu.memory_space<vmem>>, %arg7: memref<8x128xf32, #tpu.memory_space<vmem>>, %arg8: memref<8x128xbf16, #tpu.memory_space<vmem>>, %arg9: memref<8x128xf32, #tpu.memory_space<vmem>>) attributes {dimension_semantics = [#tpu.dimension_semantics<parallel>, #tpu.dimension_semantics<arbitrary>], iteration_bounds = array<i64: 1, 1>, scalar_prefetch = 0 : i64, scratch_operands = 1 : i64, tpu.core_type = #tpu.core_type<tc>, window_params = [{transform_indices = @transform_0, window_bounds = array<i64: 8, 128>}, {pipeline_mode = #tpu.pipeline_mode<synchronous>, transform_indices = @transform_1, window_bounds = array<i64: 128, 128>}, {pipeline_mode = #tpu.pipeline_mode<synchronous>, transform_indices = @transform_2, window_bounds = array<i64: 1, 128>}, {pipeline_mode = #tpu.pipeline_mode<synchronous>, transform_indices = @transform_3, window_bounds = array<i64: 128, 128>}, {pipeline_mode = #tpu.pipeline_mode<synchronous>, transform_indices = @transform_4, window_bounds = array<i64: 1, 128>}, {transform_indices = @transform_5, window_bounds = array<i64: 8, 128>}, {transform_indices = @transform_6, window_bounds = array<i64: 8, 128>}]} {
    %c0_i32 = arith.constant 0 : i32
    %0 = arith.cmpi eq, %arg1, %c0_i32 : i32
    %1 = arith.extui %0 : i1 to i32
    %c0_i32_0 = arith.constant 0 : i32
    %2 = arith.cmpi ne, %1, %c0_i32_0 : i32
    scf.if %2 {
      %cst_18 = arith.constant 0.000000e+00 : f32
      %21 = vector.broadcast %cst_18 : f32 to vector<8x128xf32>
      %c0_19 = arith.constant 0 : index
      %c0_20 = arith.constant 0 : index
      %22 = vector.load %arg9[%c0_19, %c0_20] : memref<8x128xf32, #tpu.memory_space<vmem>>, vector<8x128xf32>
      tpu.vector_store %arg9[%c0_19, %c0_20], %21 {strides = array<i32>} : memref<8x128xf32, #tpu.memory_space<vmem>>, vector<8x128xf32>,
    } else {
    }
    %c0 = arith.constant 0 : index
    %c0_1 = arith.constant 0 : index
    %3 = vector.load %arg2[%c0, %c0_1] : memref<8x128xbf16, #tpu.memory_space<vmem>>, vector<8x128xbf16>
    %c0_2 = arith.constant 0 : index
    %c0_3 = arith.constant 0 : index
    %4 = vector.load %arg3[%c0_2, %c0_3] : memref<128x128xbf16, #tpu.memory_space<vmem>>, vector<128x128xbf16>
    %cst = arith.constant dense<0.000000e+00> : vector<8x128xf32>
    %5 = tpu.matmul %3, %4, %cst {dimension_numbers = #tpu.dot_dimension_numbers<[1], [0], [0], [1], [0, 0, 1, 1], [], []>} : vector<8x128xbf16>, vector<128x128xbf16>, vector<8x128xf32> -> vector<8x128xf32>
    %c0_4 = arith.constant 0 : index
    %c0_5 = arith.constant 0 : index
    %6 = vector.load %arg4[%c0_4, %c0_5] : memref<1x128xf32, #tpu.memory_space<vmem>>, vector<1x128xf32>
    %7 = vector.broadcast %6 : vector<1x128xf32> to vector<8x128xf32>
    %8 = arith.addf %5, %7 : vector<8x128xf32>
    %cst_6 = arith.constant 0.000000e+00 : f32
    %9 = vector.broadcast %cst_6 : f32 to vector<8x128xf32>
    %10 = arith.maximumf %8, %9 : vector<8x128xf32>
    %11 = arith.truncf %10 : vector<8x128xf32> to vector<8x128xbf16>
    %c0_7 = arith.constant 0 : index
    %c0_8 = arith.constant 0 : index
    %12 = vector.load %arg8[%c0_7, %c0_8] : memref<8x128xbf16, #tpu.memory_space<vmem>>, vector<8x128xbf16>
    tpu.vector_store %arg8[%c0_7, %c0_8], %11 {strides = array<i32>} : memref<8x128xbf16, #tpu.memory_space<vmem>>, vector<8x128xbf16>,
    %c0_9 = arith.constant 0 : index
    %c0_10 = arith.constant 0 : index
    %13 = vector.load %arg9[%c0_9, %c0_10] : memref<8x128xf32, #tpu.memory_space<vmem>>, vector<8x128xf32>
    %c0_11 = arith.constant 0 : index
    %c0_12 = arith.constant 0 : index
    %14 = vector.load %arg5[%c0_11, %c0_12] : memref<128x128xbf16, #tpu.memory_space<vmem>>, vector<128x128xbf16>
    %cst_13 = arith.constant dense<0.000000e+00> : vector<8x128xf32>
    %15 = tpu.matmul %11, %14, %cst_13 {dimension_numbers = #tpu.dot_dimension_numbers<[1], [0], [0], [1], [0, 0, 1, 1], [], []>} : vector<8x128xbf16>, vector<128x128xbf16>, vector<8x128xf32> -> vector<8x128xf32>
    %16 = arith.addf %13, %15 : vector<8x128xf32>
    %c0_14 = arith.constant 0 : index
    %c0_15 = arith.constant 0 : index
    %17 = vector.load %arg9[%c0_14, %c0_15] : memref<8x128xf32, #tpu.memory_space<vmem>>, vector<8x128xf32>
    tpu.vector_store %arg9[%c0_14, %c0_15], %16 {strides = array<i32>} : memref<8x128xf32, #tpu.memory_space<vmem>>, vector<8x128xf32>,
    %c0_i32_16 = arith.constant 0 : i32
    %18 = arith.cmpi eq, %arg1, %c0_i32_16 : i32
    %19 = arith.extui %18 : i1 to i32
    %c0_i32_17 = arith.constant 0 : i32
    %20 = arith.cmpi ne, %19, %c0_i32_17 : i32
    scf.if %20 {
      %c0_18 = arith.constant 0 : index
      %c0_19 = arith.constant 0 : index
      %21 = vector.load %arg9[%c0_18, %c0_19] : memref<8x128xf32, #tpu.memory_space<vmem>>, vector<8x128xf32>
      %c0_20 = arith.constant 0 : index
      %c0_21 = arith.constant 0 : index
      %22 = vector.load %arg6[%c0_20, %c0_21] : memref<1x128xf32, #tpu.memory_space<vmem>>, vector<1x128xf32>
      %23 = vector.broadcast %22 : vector<1x128xf32> to vector<8x128xf32>
      %24 = arith.addf %21, %23 : vector<8x128xf32>
      %c0_22 = arith.constant 0 : index
      %c0_23 = arith.constant 0 : index
      %25 = vector.load %arg7[%c0_22, %c0_23] : memref<8x128xf32, #tpu.memory_space<vmem>>, vector<8x128xf32>
      tpu.vector_store %arg7[%c0_22, %c0_23], %24 {strides = array<i32>} : memref<8x128xf32, #tpu.memory_space<vmem>>, vector<8x128xf32>,
    } else {
    }
    return
  }
  func.func @transform_0(%arg0: i32, %arg1: i32) -> (i32, i32) {
    %c0_i32 = arith.constant 0 : i32
    %c0_i32_0 = arith.constant 0 : i32
    return %arg0, %c0_i32 : i32, i32
  }
  func.func @transform_1(%arg0: i32, %arg1: i32) -> (i32, i32) {
    %c0_i32 = arith.constant 0 : i32
    %c0_i32_0 = arith.constant 0 : i32
    return %c0_i32, %arg1 : i32, i32
  }
  func.func @transform_2(%arg0: i32, %arg1: i32) -> (i32, i32) {
    %c0_i32 = arith.constant 0 : i32
    %c0_i32_0 = arith.constant 0 : i32
    return %c0_i32, %arg1 : i32, i32
  }
  func.func @transform_3(%arg0: i32, %arg1: i32) -> (i32, i32) {
    %c0_i32 = arith.constant 0 : i32
    %c0_i32_0 = arith.constant 0 : i32
    return %arg1, %c0_i32 : i32, i32
  }
  func.func @transform_4(%arg0: i32, %arg1: i32) -> (i32, i32) {
    %c0_i32 = arith.constant 0 : i32
    %c0_i32_0 = arith.constant 0 : i32
    %c0_i32_1 = arith.constant 0 : i32
    return %c0_i32, %c0_i32_0 : i32, i32
  }
  func.func @transform_5(%arg0: i32, %arg1: i32) -> (i32, i32) {
    %c0_i32 = arith.constant 0 : i32
    %c0_i32_0 = arith.constant 0 : i32
    return %arg0, %c0_i32 : i32, i32
  }
  func.func @transform_6(%arg0: i32, %arg1: i32) -> (i32, i32) {
    %c0_i32 = arith.constant 0 : i32
    return %arg0, %arg1 : i32, i32
  }
}

</mosaic_0001>

<bundles_post_ra>
// kernel: forward.1
= control target key start
LH: loop header
LB: loop body
LE: loop exit
PB: predicated region body
PF: predicated region fallthrough
CT: control target
= control target key end

     0   :  { %12 = vsyncpa [#allocation4], 0  ;;  %s524_s0 = inlined_call_operand.vmem [shape: bf16[8,128], index: 0, kind: input, shape index: {}]   ;;  %s525_s1 = inlined_call_operand.hbm [shape: bf16[128,128], index: 1, kind: input, shape index: {}]   ;;  %s526_s2 = inlined_call_operand.vmem [shape: f32[1,128], index: 2, kind: input, shape index: {}]   ;;  %s527_s3 = inlined_call_operand.hbm [shape: bf16[128,128], index: 3, kind: input, shape index: {}]   ;;  %s528_s4 = inlined_call_operand.vmem [shape: f32[1,128], index: 4, kind: input, shape index: {}]   ;;  %s529_s5 = inlined_call_operand.hbm [shape: f32[8,128], index: 5, kind: output, shape index: {0}]   ;;  %s530_s6 = inlined_call_operand.hbm [shape: bf16[8,128], index: 6, kind: output, shape index: {1}]  }
   0x1   :  { %13 = vsyncpa [#allocation7], 0 }
   0x2   :  { %14 = vsyncpa [#allocation5], 0 }
   0x3   :  { %15 = vsyncpa [#allocation10], 0  ;;  %s22_s23 = sshll.u32 %s525_s1, 4  ;;  %s462_s24 = smov [#allocation3]   ;;  %s23_s23 = int_to_ptr.hbm [resolvable:$true] %s22_s23 }
   0x4   :  { %s24_s25 = sshll.u32 %s462_s24, 4  ;;  %s37_s28 = sshll.u32 %s527_s3, 4  ;;  %s25_s25 = int_to_ptr.vmem [resolvable:$true] %s24_s25  ;;  %s38_s28 = int_to_ptr.hbm [resolvable:$true] %s37_s28 }
   0x5   :  { %s463_s29 = smov 64   ;;  %s464_s30 = smov 4  }
   0x6   :  { %30 = dma.hbm_to_vmem [thread:$0]  %s23_s23, 1024, %s25_s25, [#allocation4], %s463_s29, %s463_s29, %s464_s30  }
   0x7   :  { %s465_s7 = smov [#allocation6]  }
   0x8   :  { %s39_s8 = sshll.u32 %s465_s7, 4  ;;  %s40_s8 = int_to_ptr.vmem [resolvable:$true] %s39_s8 }
   0x9   :  { %45 = dma.hbm_to_vmem [thread:$0]  %s38_s28, 1024, %s40_s8, [#allocation7], %s463_s29, %s463_s29, %s464_s30  }
   0xa   :  { %454 = dma.done.wait [#allocation4], 1024  }
   0xb   :  { %455 = vsyncadd [#allocation4], 4294966272 }
   0xc   :  { %456 = dma.done.wait [#allocation7], 1024  }
   0xd   :  { %457 = vsyncadd [#allocation7], 4294966272  ;;  %v341_v0 = vld [vmem:[#allocation3 + $0x38] sm:$0xff]  ;;  %v340_v1 = vld [vmem:[#allocation3 + $0x30] sm:$0xff]  ;;  %s466_s11 = smov [#allocation9]   ;;  %s254_s14 = sshll.u32 %s530_s6, 4  ;;  %s255_s14 = int_to_ptr.hbm [resolvable:$true] %s254_s14 }
   0xe   :  { %130 = vmatpush.bf16.msra.mxu0 %v341_v0  ;;  %v349_v2 = vld [vmem:[#allocation6 + $0x38] sm:$0xff]  ;;  %v348_v3 = vld [vmem:[#allocation6 + $0x30] sm:$0xff]  ;;  %v339_v4 = vld [vmem:[#allocation3 + $0x28] sm:$0xff]  ;;  %s252_s12 = sshll.u32 %s466_s11, 4  ;;  %s243_s20 = sshll.u32 %s529_s5, 4  ;;  %s253_s12 = int_to_ptr.vmem [resolvable:$true] %s252_s12  ;;  %s244_s20 = int_to_ptr.hbm [resolvable:$true] %s243_s20 }
   0xf   :  { %211 = vmatpush.bf16.msra.mxu1 %v349_v2  ;;  %v347_v5 = vld [vmem:[#allocation6 + $0x28] sm:$0xff]  ;;  %v338_v6 = vld [vmem:[#allocation3 + $0x20] sm:$0xff]  ;;  %v337_v8 = vld [vmem:[#allocation3 + $0x18] sm:$0xff] }
  0x10   :  { %v346_v7 = vld [vmem:[#allocation6 + $0x20] sm:$0xff]  ;;  %v345_v9 = vld [vmem:[#allocation6 + $0x18] sm:$0xff]  ;;  %v336_v10 = vld [vmem:[#allocation3 + $0x10] sm:$0xff] }
  0x11   :  { %v344_v11 = vld [vmem:[#allocation6 + $0x10] sm:$0xff]  ;;  %v335_v12 = vld [vmem:[#allocation3 + $0x8] sm:$0xff]  ;;  %v334_v13 = vld [vmem:[#allocation3] sm:$0xff] }
  0x12   :  { %131 = vmatpush.bf16.msra.mxu0 %v340_v1  ;;  %v61_v14 = vld [vmem:[%s524_s0] sm:$0xf]  ;;  %v343_v15 = vld [vmem:[#allocation6 + $0x8] sm:$0xff] }
  0x13   :  { %212 = vmatpush.bf16.msra.mxu1 %v348_v3  ;;  %v342_v16 = vld [vmem:[#allocation6] sm:$0xff] }
  0x14   :  { %v356_v17 = vld [vmem:[%s526_s2] ss:$0 sm:$0xff]  ;;  %s467_s2 = smov [#allocation8]  }
  0x15   :  { %v357_v23 = vld [vmem:[%s528_s4] ss:$0 sm:$0xff]  ;;  %s241_s17 = sshll.u32 %s467_s2, 4  ;;  %s242_s17 = int_to_ptr.vmem [resolvable:$true] %s241_s17 }
  0x16   :  { %132 = vmatpush.bf16.msra.mxu0 %v339_v4 }
  0x17   :  { %213 = vmatpush.bf16.msra.mxu1 %v347_v5 }
  0x1a   :  { %133 = vmatpush.bf16.msra.mxu0 %v338_v6 }
  0x1b   :  { %214 = vmatpush.bf16.msra.mxu1 %v346_v7 }
  0x1e   :  { %134 = vmatpush.bf16.msra.mxu0 %v337_v8 }
  0x1f   :  { %215 = vmatpush.bf16.msra.mxu1 %v345_v9 }
  0x22   :  { %135 = vmatpush.bf16.msra.mxu0 %v336_v10 }
  0x23   :  { %216 = vmatpush.bf16.msra.mxu1 %v344_v11 }
  0x26   :  { %136 = vmatpush.bf16.msra.mxu0 %v335_v12 }
  0x27   :  { %217 = vmatpush.bf16.msra.mxu1 %v343_v15 }
  0x2a   :  { %137 = vmatpush.bf16.msra.mxu0 %v334_v13 }
  0x2b   :  { %218 = vmatpush.bf16.msra.mxu1 %v342_v16 }
  0x2d   :  { %138 = vmatmul.bf16.vlgmr.msra.gmra.mxu0 %v61_v14 }
  0xaa   :  { %v139_v18 = vpop.f32.mrf.mxu0 }
  0xab   :  { %v140_v19 = vadd.f32 %v356_v17, %v139_v18 }
  0xad   :  { %v143_v20 = vmax.f32 %v140_v19, 0.0 }
  0xaf   :  { %v144_v21 = vpack.c.bf16 %v143_v20, %v143_v20 }
  0xb1   :  { %219 = vmatmul.bf16.vlgmr.msra.gmra.mxu1 %v144_v21  ;;  %145 = vst [vmem:[#allocation9] sm:$0xf] %v144_v21 }
  0xb2   :  { %v141_v22 = vpop.f32.mrf.mxu0  ;;  %257 = dma.vmem_to_hbm [thread:$0]  %s253_s12, 64, %s255_s14, [#allocation10]  }
 0x12e   :  { %v220_v24 = vpop.f32.mrf.mxu1 }
 0x12f   :  { %v234_v25 = vadd.f32 %v357_v23, %v220_v24 }
 0x131   :  { %235 = vst [vmem:[#allocation8] sm:$0xff] %v234_v25 }
 0x132   :  { %246 = dma.vmem_to_hbm [thread:$0]  %s242_s17, 128, %s244_s20, [#allocation5]  }
 0x136   :  { %v222_v26 = vpop.f32.mrf.mxu1 }
 0x137   :  { %458 = dma.done.wait [#allocation5], 128  }
 0x138   :  { %459 = vsyncadd [#allocation5], 4294967168 }
 0x139   :  { %460 = dma.done.wait [#allocation10], 64  }
 0x13a   :  { %461 = vsyncadd [#allocation10], 4294967232 }
 0x13b   :  { %266 = vsyncpa [#allocation4], 1 }
 0x13c   :  { %267 = vsyncpa [#allocation7], 1 }
 0x13d   :  { %268 = vsyncpa [#allocation5], 1 }
 0x13e   :  { %269 = vsyncpa [#allocation10], 1 }

</bundles_post_ra>
